<compile_context>
chip_gen: v7x
topology: tpu7x:2x2x1
jax: 0.10.0
libtpu: 0.0.40
codegen_flags: <defaults>
</compile_context>

<pallas_src>
import functools
import math

import jax
import jax.numpy as jnp
from jax import lax
from jax.experimental import pallas as pl
from jax.experimental.pallas import tpu as pltpu

# Explicit scoped-VMEM budget (don't rely on the 16/32 MiB default); the tile
# choices below keep double-buffered inputs + scratch well under this, which
# also fits v7x's 64 MiB physical VMEM.
_VMEM_LIMIT_BYTES = 64 * 1024 * 1024


def _mxu_tile_default():
    """256 for v6e/v7x (2x256x256 MXU), 128 for v5e (4x128x128 MXU)."""
    try:
        kind = jax.devices()[0].device_kind.lower()
    except Exception:
        kind = ""
    if "v5 lite" in kind or "v5e" in kind or "v5lite" in kind:
        return 128
    return 256


def _pick_tile(dim, target):
    """Largest 'nice' tile <= target dividing dim (falls back to dim itself)."""
    if dim <= target:
        return dim
    for t in (target, target // 2, 128, 64, 32, 16, 8):
        if t > 0 and dim % t == 0:
            return t
    return dim


# ----------------- Tiled matmul kernel (c_attn and proj linears) ------------

def _linear_kernel(x_ref, w_ref, o_ref, acc_ref):
    @pl.when(pl.program_id(2) == 0)
    def _():
        acc_ref[...] = jnp.zeros_like(acc_ref)

    acc_ref[...] += jnp.dot(x_ref[...], w_ref[...],
                            preferred_element_type=jnp.float32)

    @pl.when(pl.program_id(2) == pl.num_programs(2) - 1)
    def _():
        o_ref[...] = acc_ref[...].astype(o_ref.dtype)


def pallas_linear(x2d, w, *, out_dtype=None):
    """x2d: (M, K) @ w: (K, N) -> (M, N), tiled with an f32 VMEM accumulator."""
    M, K = x2d.shape
    K2, N = w.shape
    assert K == K2
    out_dtype = out_dtype or x2d.dtype

    t = _mxu_tile_default()
    tm = _pick_tile(M, t)
    tn = _pick_tile(N, t)
    tk = _pick_tile(K, 2 * t)
    grid = (M // tm, N // tn, K // tk)

    bytes_accessed = int(x2d.size * x2d.dtype.itemsize
                         + w.size * w.dtype.itemsize
                         + M * N * jnp.dtype(out_dtype).itemsize)

    return pl.pallas_call(
        _linear_kernel,
        out_shape=jax.ShapeDtypeStruct((M, N), out_dtype),
        grid_spec=pltpu.PrefetchScalarGridSpec(
            num_scalar_prefetch=0,
            grid=grid,
            in_specs=[pl.BlockSpec((tm, tk), lambda i, j, k: (i, k)),
                      pl.BlockSpec((tk, tn), lambda i, j, k: (k, j))],
            out_specs=pl.BlockSpec((tm, tn), lambda i, j, k: (i, j)),
            scratch_shapes=[pltpu.VMEM((tm, tn), jnp.float32)]),
        compiler_params=pltpu.CompilerParams(
            dimension_semantics=("parallel", "parallel", "arbitrary"),
            vmem_limit_bytes=_VMEM_LIMIT_BYTES),
        cost_estimate=pl.CostEstimate(flops=2 * M * N * K, transcendentals=0,
                                      bytes_accessed=bytes_accessed),
    )(x2d, w)


# ----------------- Flash-style causal GQA attention kernel ------------------

def _flash_gqa_kernel(q_ref, k_ref, v_ref, cos_q_ref, sin_q_ref, cos_k_ref,
                      sin_k_ref, rot_ref, o_ref,
                      qc_ref, m_ref, l_ref, acc_ref,
                      *, tq, tk, n_head, n_kv_groups, scale):
    qi = pl.program_id(1)
    ki = pl.program_id(2)
    q_per_kv = n_head // n_kv_groups
    q_start = qi * tq
    kv_start = ki * tk

    # ---- init + RoPE(q) + scale, once per (b, q-tile); cached across kv steps
    @pl.when(ki == 0)
    def _init():
        m_ref[...] = jnp.full_like(m_ref, -jnp.inf)
        l_ref[...] = jnp.zeros_like(l_ref)
        acc_ref[...] = jnp.zeros_like(acc_ref)
        cos_q = cos_q_ref[...]                               # (tq, D) f32
        sin_q = sin_q_ref[...]
        rot = rot_ref[...]                                   # (D, D) 0/+-1
        for h in range(n_head):
            qh = q_ref[0, :, h, :].astype(jnp.float32)       # (tq, D)
            qh_rot = jnp.dot(qh, rot, preferred_element_type=jnp.float32)
            qh = (qh * cos_q + qh_rot * sin_q) * scale       # fold 1/sqrt(D) into q
            qc_ref[h] = qh.astype(qc_ref.dtype)

    # ---- causal block skip: only KV tiles intersecting the lower triangle ----
    @pl.when(kv_start < q_start + tq)
    def _compute():
        cos_k = cos_k_ref[...]                               # (tk, D) f32
        sin_k = sin_k_ref[...]
        rot = rot_ref[...]
        # Tile-local causal mask (tq, tk), shared by all heads -- no (T, T) iota.
        qpos = q_start + lax.broadcasted_iota(jnp.int32, (tq, tk), 0)
        kpos = kv_start + lax.broadcasted_iota(jnp.int32, (tq, tk), 1)
        causal = kpos <= qpos
        for g in range(n_kv_groups):
            # One K/V tile per group, RoPE'd once and reused by every q head of
            # the group (GQA reuse -- KV is never re-fetched per head).
            kg = k_ref[0, :, g, :].astype(jnp.float32)       # (tk, D)
            kg_rot = jnp.dot(kg, rot, preferred_element_type=jnp.float32)
            kg = (kg * cos_k + kg_rot * sin_k).astype(k_ref.dtype)
            vg = v_ref[0, :, g, :]                           # (tk, D)
            for j in range(q_per_kv):
                h = g * q_per_kv + j
                qh = qc_ref[h]                               # (tq, D) roped+scaled
                s = lax.dot_general(qh, kg, (((1,), (1,)), ((), ())),
                                    preferred_element_type=jnp.float32)  # (tq, tk)
                s = jnp.where(causal, s, -jnp.inf)
                m_prev = m_ref[h]
                m_new = jnp.maximum(m_prev, jnp.max(s, axis=-1, keepdims=True))
                alpha = jnp.exp(m_prev - m_new)
                p = jnp.exp(s - m_new)
                l_ref[h] = alpha * l_ref[h] + jnp.sum(p, axis=-1, keepdims=True)
                pv = jnp.dot(p.astype(vg.dtype), vg,
                             preferred_element_type=jnp.float32)
                acc_ref[h] = alpha * acc_ref[h] + pv
                m_ref[h] = m_new

    # ---- finalize: normalize and store the (tq, H, D) output tile ------------
    @pl.when(ki == pl.num_programs(2) - 1)
    def _finalize():
        for h in range(n_head):
            inv_l = pl.reciprocal(l_ref[h], approx=False)
            o_ref[0, :, h, :] = (acc_ref[h] * inv_l).astype(o_ref.dtype)


def pallas_flash_gqa_attention(q, k, v, cos, sin, rot, *, q_tile=None,
                               kv_tile=None):
    """q: (B, T, H, D); k, v: (B, T, G, D); cos/sin: (T, D); rot: (D, D)."""
    B, T, H, D = q.shape
    G = k.shape[2]
    t = _mxu_tile_default()
    tq = _pick_tile(T, q_tile or t)
    tk = _pick_tile(T, kv_tile or t)
    nq, nk = T // tq, T // tk
    scale = 1.0 / math.sqrt(D)

    def q_map(b, qi, ki):
        return (b, qi, 0, 0)

    def kv_map(b, qi, ki):
        # Clamp fully-masked (future) KV tiles to the last needed tile so the
        # pipeline reuses the previous DMA instead of fetching dead data.
        last_needed = (qi * tq + tq - 1) // tk
        return (b, jnp.minimum(ki, last_needed), 0, 0)

    def cos_q_map(b, qi, ki):
        return (qi, 0)

    def cos_k_map(b, qi, ki):
        last_needed = (qi * tq + tq - 1) // tk
        return (jnp.minimum(ki, last_needed), 0)

    kernel = functools.partial(_flash_gqa_kernel, tq=tq, tk=tk, n_head=H,
                               n_kv_groups=G, scale=scale)

    itemsize = q.dtype.itemsize
    flops = 2 * B * H * T * T * D                  # ~causal half of QK^T + PV
    transcendentals = (B * H * T * T) // 2         # exp
    bytes_accessed = int((2 * q.size + k.size + v.size) * itemsize)

    return pl.pallas_call(
        kernel,
        out_shape=jax.ShapeDtypeStruct((B, T, H, D), q.dtype),
        grid_spec=pltpu.PrefetchScalarGridSpec(
            num_scalar_prefetch=0,
            grid=(B, nq, nk),
            in_specs=[
                pl.BlockSpec((1, tq, H, D), q_map),
                pl.BlockSpec((1, tk, G, D), kv_map),
                pl.BlockSpec((1, tk, G, D), kv_map),
                pl.BlockSpec((tq, D), cos_q_map),
                pl.BlockSpec((tq, D), cos_q_map),
                pl.BlockSpec((tk, D), cos_k_map),
                pl.BlockSpec((tk, D), cos_k_map),
                pl.BlockSpec((D, D), lambda b, qi, ki: (0, 0)),
            ],
            out_specs=pl.BlockSpec((1, tq, H, D), q_map),
            scratch_shapes=[
                pltpu.VMEM((H, tq, D), q.dtype),      # RoPE'd + pre-scaled q cache
                pltpu.VMEM((H, tq, 1), jnp.float32),  # running max
                pltpu.VMEM((H, tq, 1), jnp.float32),  # running sum
                pltpu.VMEM((H, tq, D), jnp.float32),  # un-normalized accumulator
            ]),
        compiler_params=pltpu.CompilerParams(
            dimension_semantics=("parallel", "parallel", "arbitrary"),
            vmem_limit_bytes=_VMEM_LIMIT_BYTES),
        cost_estimate=pl.CostEstimate(flops=int(flops),
                                      transcendentals=int(transcendentals),
                                      bytes_accessed=bytes_accessed),
    )(q, k, v, cos, sin, cos, sin, rot)


# ----------------- RoPE tables & QKV weight permutation ---------------------

def _rope_tables(T, D, theta):
    """cos/sin tables (T, D) with repeated freqs, plus the exact rotate_half
    matrix R:  (x @ R)[2i] = -x[2i+1],  (x @ R)[2i+1] = x[2i]."""
    inv_freq = 1.0 / (theta ** (jnp.arange(0, D, 2, dtype=jnp.float32) / D))
    t = jnp.arange(T, dtype=jnp.float32)
    freqs = jnp.repeat(t[:, None] * inv_freq[None, :], 2, axis=-1)   # (T, D)
    cos = jnp.cos(freqs).astype(jnp.float32)
    sin = jnp.sin(freqs).astype(jnp.float32)
    r = jnp.arange(D)[:, None]
    c = jnp.arange(D)[None, :]
    rot = jnp.where((r == c + 1) & (c % 2 == 0), -1.0,
                    jnp.where((c == r + 1) & (r % 2 == 0), 1.0, 0.0))
    return cos, sin, rot.astype(jnp.float32)


def _permute_qkv_weight(w_attn, n_head, n_query_groups, head_size):
    """Reorder c_attn output columns from per-group [q..q, k, v] interleaving to
    contiguous [Q(H*D) | K(G*D) | V(G*D)] so q/k/v are free reshapes of the fused
    projection output (no strided gathers or transposes on activations)."""
    q_per_kv = n_head // n_query_groups
    total = q_per_kv + 2
    d = jnp.arange(head_size)

    def block(g, slot):
        return (g * total + slot) * head_size + d

    q_cols = [block(g, j) for g in range(n_query_groups) for j in range(q_per_kv)]
    k_cols = [block(g, q_per_kv) for g in range(n_query_groups)]
    v_cols = [block(g, q_per_kv + 1) for g in range(n_query_groups)]
    perm = jnp.concatenate(q_cols + k_cols + v_cols)
    return w_attn[:, perm]


# ----------------- Full forward ---------------------------------------------

def causal_self_attention(x, w_attn, w_proj, *, n_head, n_query_groups,
                          head_size, rope_theta, q_tile=None, kv_tile=None):
    B, T, C = x.shape
    H, G, D = n_head, n_query_groups, head_size
    HD, GD = H * D, G * D

    w_qkv = _permute_qkv_weight(w_attn, H, G, D)        # one-time weight reorder

    qkv = pallas_linear(x.reshape(B * T, C), w_qkv)     # (B*T, HD + 2*GD)
    qkv = qkv.reshape(B, T, HD + 2 * GD)
    q = qkv[..., :HD].reshape(B, T, H, D)               # contiguous slice + free reshape
    k = qkv[..., HD:HD + GD].reshape(B, T, G, D)
    v = qkv[..., HD + GD:].reshape(B, T, G, D)

    cos, sin, rot = _rope_tables(T, D, rope_theta)      # RoPE fused into attention kernel

    y = pallas_flash_gqa_attention(q, k, v, cos, sin, rot,
                                   q_tile=q_tile, kv_tile=kv_tile)  # (B, T, H, D)
    y = y.reshape(B * T, HD)                            # free trailing merge, no transpose
    y = pallas_linear(y, w_proj).reshape(B, T, -1)
    return y


# ----------------- Pure-JAX reference for the correctness check -------------

def rotary_embed(x, theta):
    """x: (..., T, D).  Standard 'lang' freqs, interleaved rotate_half."""
    T, D = x.shape[-2], x.shape[-1]
    inv_freq = 1.0 / (theta ** (jnp.arange(0, D, 2, dtype=jnp.float32) / D))
    t = jnp.arange(T, dtype=jnp.float32)
    freqs = t[:, None] * inv_freq[None, :]
    freqs = jnp.repeat(freqs, 2, axis=-1)
    cos, sin = jnp.cos(freqs), jnp.sin(freqs)
    x1 = x[..., 0::2]
    x2 = x[..., 1::2]
    rot = jnp.stack((-x2, x1), axis=-1).reshape(x.shape)
    return x * cos + rot * sin


def reference(x, w_attn, w_proj, *, n_head, n_query_groups, head_size, rope_theta):
    B, T, C = x.shape
    q_per_kv = n_head // n_query_groups
    qkv = (x.reshape(B * T, C) @ w_attn).reshape(
        B, T, n_query_groups, q_per_kv + 2, head_size)
    q = qkv[:, :, :, :q_per_kv, :].reshape(B, T, n_head, head_size).transpose(0, 2, 1, 3)
    k = qkv[:, :, :, q_per_kv, :].transpose(0, 2, 1, 3)
    v = qkv[:, :, :, q_per_kv + 1, :].transpose(0, 2, 1, 3)
    q = rotary_embed(q, rope_theta)
    k = rotary_embed(k, rope_theta)
    k = jnp.repeat(k, q_per_kv, axis=1)
    v = jnp.repeat(v, q_per_kv, axis=1)
    s = jnp.einsum('bhqd,bhkd->bhqk', q, k) / math.sqrt(head_size)
    mask = jnp.tril(jnp.ones((T, T), dtype=bool))
    s = jnp.where(mask, s, -jnp.inf)
    att = jax.nn.softmax(s, axis=-1)
    y = jnp.einsum('bhqk,bhkd->bhqd', att, v)
    y = y.transpose(0, 2, 1, 3).reshape(B, T, n_head * head_size)
    return y @ w_proj


if __name__ == "__main__":
    # config: n_embd=32, n_head=4, n_query_groups=2 (GQA), head_size=8,
    #         block_size=T=8, bias=False, dropout=0.0, rope_theta=10000.0
    B, T, C = 2, 8, 32
    n_head, n_query_groups, head_size = 4, 2, 8
    rope_theta = 10000.0
    attn_out = (n_head + 2 * n_query_groups) * head_size     # 64

    key = jax.random.PRNGKey(0)
    kx, kw1, kw2 = jax.random.split(key, 3)
    x = jax.random.normal(kx, (B, T, C), dtype=jnp.float32)
    w_attn = 0.02 * jax.random.normal(kw1, (C, attn_out), dtype=jnp.float32)
    w_proj = 0.02 * jax.random.normal(kw2, (n_head * head_size, C), dtype=jnp.float32)

    kwargs = dict(n_head=n_head, n_query_groups=n_query_groups,
                  head_size=head_size, rope_theta=rope_theta)

    y = causal_self_attention(x, w_attn, w_proj, **kwargs)
    y = jax.block_until_ready(y)

    y_ref = reference(x, w_attn, w_proj, **kwargs)
    assert y.shape == (B, T, C)
    max_diff = float(jnp.max(jnp.abs(y - y_ref)))
    assert jnp.allclose(y, y_ref, atol=5e-5, rtol=5e-5), (
        f"mismatch vs reference (max abs diff = {max_diff})")

    print("KERNEL_OK")
</pallas_src>

<mosaic_0001>
module attributes {stable_mosaic.version = 11 : i64} {
  func.func @_linear_kernel(%arg0: i32, %arg1: i32, %arg2: i32, %arg3: memref<16x32xf32, #tpu.memory_space<vmem>>, %arg4: memref<32x64xf32, #tpu.memory_space<vmem>>, %arg5: memref<16x64xf32, #tpu.memory_space<vmem>>, %arg6: memref<16x64xf32, #tpu.memory_space<vmem>>) attributes {dimension_semantics = [#tpu.dimension_semantics<parallel>, #tpu.dimension_semantics<parallel>, #tpu.dimension_semantics<arbitrary>], iteration_bounds = array<i64: 1, 1, 1>, scalar_prefetch = 0 : i64, scratch_operands = 1 : i64, tpu.core_type = #tpu.core_type<tc>, window_params = [{transform_indices = @transform_0, window_bounds = array<i64: 16, 32>}, {transform_indices = @transform_1, window_bounds = array<i64: 32, 64>}, {transform_indices = @transform_2, window_bounds = array<i64: 16, 64>}]} {
    %c0_i32 = arith.constant 0 : i32
    %0 = arith.cmpi eq, %arg2, %c0_i32 : i32
    %1 = arith.extui %0 : i1 to i32
    %c0_i32_0 = arith.constant 0 : i32
    %2 = arith.cmpi ne, %1, %c0_i32_0 : i32
    scf.if %2 {
      %cst_10 = arith.constant 0.000000e+00 : f32
      %12 = vector.broadcast %cst_10 : f32 to vector<16x64xf32>
      %c0_11 = arith.constant 0 : index
      %c0_12 = arith.constant 0 : index
      %13 = vector.load %arg6[%c0_11, %c0_12] : memref<16x64xf32, #tpu.memory_space<vmem>>, vector<16x64xf32>
      tpu.vector_store %arg6[%c0_11, %c0_12], %12 {strides = array<i32>} : memref<16x64xf32, #tpu.memory_space<vmem>>, vector<16x64xf32>,
    } else {
    }
    %c0 = arith.constant 0 : index
    %c0_1 = arith.constant 0 : index
    %3 = vector.load %arg6[%c0, %c0_1] : memref<16x64xf32, #tpu.memory_space<vmem>>, vector<16x64xf32>
    %c0_2 = arith.constant 0 : index
    %c0_3 = arith.constant 0 : index
    %4 = vector.load %arg3[%c0_2, %c0_3] : memref<16x32xf32, #tpu.memory_space<vmem>>, vector<16x32xf32>
    %c0_4 = arith.constant 0 : index
    %c0_5 = arith.constant 0 : index
    %5 = vector.load %arg4[%c0_4, %c0_5] : memref<32x64xf32, #tpu.memory_space<vmem>>, vector<32x64xf32>
    %cst = arith.constant dense<0.000000e+00> : vector<16x64xf32>
    %6 = tpu.matmul %4, %5, %cst {dimension_numbers = #tpu.dot_dimension_numbers<[1], [0], [0], [1], [0, 0, 1, 1], [], []>} : vector<16x32xf32>, vector<32x64xf32>, vector<16x64xf32> -> vector<16x64xf32>
    %7 = arith.addf %3, %6 : vector<16x64xf32>
    %c0_6 = arith.constant 0 : index
    %c0_7 = arith.constant 0 : index
    %8 = vector.load %arg6[%c0_6, %c0_7] : memref<16x64xf32, #tpu.memory_space<vmem>>, vector<16x64xf32>
    tpu.vector_store %arg6[%c0_6, %c0_7], %7 {strides = array<i32>} : memref<16x64xf32, #tpu.memory_space<vmem>>, vector<16x64xf32>,
    %c0_i32_8 = arith.constant 0 : i32
    %9 = arith.cmpi eq, %arg2, %c0_i32_8 : i32
    %10 = arith.extui %9 : i1 to i32
    %c0_i32_9 = arith.constant 0 : i32
    %11 = arith.cmpi ne, %10, %c0_i32_9 : i32
    scf.if %11 {
      %c0_10 = arith.constant 0 : index
      %c0_11 = arith.constant 0 : index
      %12 = vector.load %arg6[%c0_10, %c0_11] : memref<16x64xf32, #tpu.memory_space<vmem>>, vector<16x64xf32>
      %c0_12 = arith.constant 0 : index
      %c0_13 = arith.constant 0 : index
      %13 = vector.load %arg5[%c0_12, %c0_13] : memref<16x64xf32, #tpu.memory_space<vmem>>, vector<16x64xf32>
      tpu.vector_store %arg5[%c0_12, %c0_13], %12 {strides = array<i32>} : memref<16x64xf32, #tpu.memory_space<vmem>>, vector<16x64xf32>,
    } else {
    }
    return
  }
  func.func @transform_0(%arg0: i32, %arg1: i32, %arg2: i32) -> (i32, i32) {
    %c0_i32 = arith.constant 0 : i32
    return %arg0, %arg2 : i32, i32
  }
  func.func @transform_1(%arg0: i32, %arg1: i32, %arg2: i32) -> (i32, i32) {
    %c0_i32 = arith.constant 0 : i32
    return %arg2, %arg1 : i32, i32
  }
  func.func @transform_2(%arg0: i32, %arg1: i32, %arg2: i32) -> (i32, i32) {
    %c0_i32 = arith.constant 0 : i32
    return %arg0, %arg1 : i32, i32
  }
}

</mosaic_0001>

<bundles_post_ra>
// kernel: tpu_custom_call.1
= control target key start
LH: loop header
LB: loop body
LE: loop exit
PB: predicated region body
PF: predicated region fallthrough
CT: control target
= control target key end

     0   :  { %7 = vsyncpa [#allocation4], 0  ;;  %s344_s0 = inlined_call_operand.hbm [shape: f32[16,32], index: 0, kind: input, shape index: {}]   ;;  %s345_s1 = inlined_call_operand.hbm [shape: f32[32,64], index: 1, kind: input, shape index: {}]   ;;  %s346_s2 = inlined_call_operand.hbm [shape: f32[16,64], index: 2, kind: output, shape index: {}]  }
   0x1   :  { %8 = vsyncpa [#allocation7], 0 }
   0x2   :  { %9 = vsyncpa [#allocation5], 0  ;;  %s272_s9 = smov [#allocation3]   ;;  %s200_s13 = scalar_lea.hbm %s344_s0, 256 }
   0x3   :  { %s15_s10 = sshll.u32 %s272_s9, 4  ;;  %p201_p0 = scmp.ne.s32.totalorder %s344_s0, %s200_s13  ;;  %s16_s10 = int_to_ptr.vmem [resolvable:$true] %s15_s10 }
   0x4   :  { %p204_p1 = scmp.lt.u32.totalorder %s200_s13, %s344_s0 }
   0x6   :  { %p206_p2 = pnand %p204_p1, %p201_p0 }
   0x8   :  { %209 = shalt.err (!%p206_p2)
}
   0x9   :  { %s210_s18 = scalar_lea.vmem %s16_s10, 256  ;;  %p215_p4 = scmp.lt.s32.totalorder %s16_s10, %s16_s10 }
   0xa   :  { %p211_p3 = scmp.ne.s32.totalorder %s16_s10, %s210_s18  ;;  %p216_p5 = scmp.lt.s32.totalorder %s210_s18, %s210_s18 }
   0xc   :  { %p217_p6 = por %p216_p5, %p215_p4 }
   0xe   :  { %p218_p7 = pnand %p217_p6, %p211_p3 }
  0x10   :  { %221 = shalt.err (!%p218_p7)
}
  0x11   :  { %s273_s19 = smov 128   ;;  %s274_s20 = smov 8  }
  0x12   :  { %21 = dma.hbm_to_vmem [thread:$0]  %s344_s0, 256, %s16_s10, [#allocation4], %s273_s19, %s273_s19, %s274_s20  }
  0x13   :  { %s275_s23 = smov [#allocation6]   ;;  %s222_s27 = scalar_lea.hbm %s345_s1, 512 }
  0x14   :  { %s27_s24 = sshll.u32 %s275_s23, 4  ;;  %p223_p8 = scmp.ne.s32.totalorder %s345_s1, %s222_s27  ;;  %s28_s24 = int_to_ptr.vmem [resolvable:$true] %s27_s24 }
  0x15   :  { %p226_p9 = scmp.lt.u32.totalorder %s222_s27, %s345_s1 }
  0x17   :  { %p228_p10 = pnand %p226_p9, %p223_p8 }
  0x19   :  { %231 = shalt.err (!%p228_p10)
}
  0x1a   :  { %s232_s4 = scalar_lea.vmem %s28_s24, 512  ;;  %p237_p12 = scmp.lt.s32.totalorder %s28_s24, %s28_s24 }
  0x1b   :  { %p233_p11 = scmp.ne.s32.totalorder %s28_s24, %s232_s4  ;;  %p238_p13 = scmp.lt.s32.totalorder %s232_s4, %s232_s4 }
  0x1d   :  { %p239_p0 = por %p238_p13, %p237_p12 }
  0x1f   :  { %p240_p1 = pnand %p239_p0, %p233_p11 }
  0x21   :  { %243 = shalt.err (!%p240_p1)
}
  0x22   :  { %33 = dma.hbm_to_vmem [thread:$0]  %s345_s1, 512, %s28_s24, [#allocation7], %s273_s19, %s273_s19, %s274_s20  }
  0x23   :  { %266 = dma.done.wait [#allocation4], 256  }
  0x24   :  { %267 = vsyncadd [#allocation4], 4294967040 }
  0x25   :  { %268 = dma.done.wait [#allocation7], 512  }
  0x26   :  { %269 = vsyncadd [#allocation7], 4294966784  ;;  %vm44_vm0 = vcmask 523264   ;;  %v276_v0 = vmov 0.0   ;;  %vm55_vm1 = vcmask 261120   ;;  %v51_v1 = vld [vmem:[#allocation6] sm:$0xff] }
  0x27   :  { %46 = vst.msk [vmem:[#allocation2 + $0x8] sm:$0xff] %vm44_vm0, %v276_v0  ;;  %45 = vst.msk [vmem:[#allocation2] sm:$0xff] %vm44_vm0, %v276_v0  ;;  %v52_v2 = vld [vmem:[#allocation6 + $0x8] sm:$0xff]  ;;  %v53_v3 = vld [vmem:[#allocation6 + $0x10] sm:$0xff]  ;;  %s277_s1 = smov [#allocation8]  }
  0x28   :  { %v186_v4 = vpack.c.bf16 %v52_v2, %v51_v1  ;;  %v54_v5 = vld [vmem:[#allocation6 + $0x18] sm:$0xff]  ;;  %v49_v6 = vld [vmem:[#allocation3] sm:$0xff]  ;;  %s154_s6 = sshll.u32 %s277_s1, 4  ;;  %s155_s6 = int_to_ptr.vmem [resolvable:$true] %s154_s6 }
  0x29   :  { %v190_v7 = vpack.c.bf16 %v54_v5, %v53_v3  ;;  %183 = vmatprep.mubr.msk.f32.mxu0 %vm55_vm1, %v49_v6  ;;  %v50_v8 = vld [vmem:[#allocation3 + $0x8] sm:$0xff]  ;;  %s244_s7 = scalar_lea.vmem %s155_s6, 256  ;;  %p249_p3 = scmp.lt.s32.totalorder %s155_s6, %s155_s6 }
  0x2a   :  { %187 = vmatprep.subr.bf16.mxu0 %v186_v4  ;;  %p245_p2 = scmp.ne.s32.totalorder %s155_s6, %s244_s7  ;;  %p250_p4 = scmp.lt.s32.totalorder %s244_s7, %s244_s7 }
  0x2b   :  { %189 = vmatpush3.bf16.msra.mxu0 %v186_v4 }
  0x2c   :  { %191 = vmatprep.subr.bf16.mxu0 %v190_v7  ;;  %p251_p5 = por %p250_p4, %p249_p3 }
  0x2e   :  { %v48_v9 = vld [vmem:[#allocation2 + $0x8] sm:$0xff]  ;;  %v47_v10 = vld [vmem:[#allocation2] sm:$0xff]  ;;  %p252_p6 = pnand %p251_p5, %p245_p2 }
  0x2f   :  { %193 = vmatpush3.bf16.msra.mxu0 %v190_v7 }
  0x32   :  { %184 = vmatmul.mubr.msk.f32.vlgmr.msra.gmra.mrb[0].mxu0 %vm55_vm1, %v50_v8 }
 0x105   :  { %v185_v11 = vpop.f32.mrb[0].mxu0 }
 0x106   :  { %v138_v12 = vadd.f32 %v185_v11, %v48_v9  ;;  %v128_v13 = vpop.f32.mrb[1].mxu0 }
 0x107   :  { %v137_v14 = vadd.f32 %v128_v13, %v47_v10 }
 0x108   :  { %141 = vst.msk [vmem:[#allocation2 + $0x8] sm:$0xff] %vm44_vm0, %v138_v12 }
 0x109   :  { %140 = vst.msk [vmem:[#allocation2] sm:$0xff] %vm44_vm0, %v137_v14 }
 0x10f   :  { %v146_v15 = vld [vmem:[#allocation2 + $0x8] sm:$0xff] }
 0x110   :  { %v145_v16 = vld [vmem:[#allocation2] sm:$0xff]  ;;  %148 = vst.msk [vmem:[#allocation8 + $0x8] sm:$0xff] %vm44_vm0, %v146_v15 }
 0x111   :  { %147 = vst.msk [vmem:[#allocation8] sm:$0xff] %vm44_vm0, %v145_v16 }
 0x112   :  { %255 = shalt.err (!%p252_p6)
}
 0x113   :  { %s256_s10 = scalar_lea.hbm %s346_s2, 256 }
 0x114   :  { %p257_p7 = scmp.ne.s32.totalorder %s346_s2, %s256_s10  ;;  %p260_p8 = scmp.lt.u32.totalorder %s256_s10, %s346_s2 }
 0x116   :  { %p262_p9 = pnand %p260_p8, %p257_p7 }
 0x118   :  { %265 = shalt.err (!%p262_p9)
}
 0x119   :  { %160 = dma.vmem_to_hbm [thread:$0]  %s155_s6, 256, %s346_s2, [#allocation5], %s273_s19, %s273_s19, %s274_s20  }
 0x11a   :  { %270 = dma.done.wait [#allocation5], 256  }
 0x11b   :  { %271 = vsyncadd [#allocation5], 4294967040 }
 0x11c   :  { %164 = vsyncpa [#allocation4], 1 }
 0x11d   :  { %165 = vsyncpa [#allocation7], 1 }
 0x11e   :  { %166 = vsyncpa [#allocation5], 1 }

</bundles_post_ra>
